<compile_context>
chip_gen: v7x
topology: tpu7x:2x2x1
jax: 0.10.0
libtpu: 0.0.40
codegen_flags: <defaults>
</compile_context>

<pallas_src>
import functools

import jax
import jax.numpy as jnp
from jax.experimental import pallas as pl
from jax.experimental.pallas import tpu as pltpu


def _round_up(x, m):
    return (x + m - 1) // m * m


def _patch_embed_kernel(p_ref, w_ref, prm_ref, o_ref, *, eps):
    # p_ref:   (TILE_M, K)  im2col patch rows (bf16 or f32), streamed / double-buffered
    # w_ref:   (K, E)       conv weight reshaped+transposed, resident
    # prm_ref: (3, E)       row 0 = conv bias, row 1 = LN gamma, row 2 = LN beta (f32)
    # o_ref:   (TILE_M, E)  output rows
    y = jnp.dot(p_ref[...], w_ref[...], preferred_element_type=jnp.float32)
    prm = prm_ref[...]
    y = y + prm[0:1, :]
    # One-pass LayerNorm statistics in f32 (biased variance, like nn.LayerNorm).
    mean = jnp.mean(y, axis=-1, keepdims=True)
    mean_sq = jnp.mean(y * y, axis=-1, keepdims=True)
    var = jnp.maximum(mean_sq - mean * mean, 0.0)
    y = (y - mean) * jax.lax.rsqrt(var + eps)
    o_ref[...] = (y * prm[1:2, :] + prm[2:3, :]).astype(o_ref.dtype)


def _im2col(x, kh, kw, stride, pad):
    """x: (B, C, H, W) -> patches (B*Hout*Wout, C*kh*kw) in (b, h_out, w_out) row order
    and (C, kh, kw) column order (matches conv_w.reshape(E, -1))."""
    # HIGHEST only needed for exact f32 patch extraction; on bf16 input the
    # identity-filter conv is exact at default precision (1.0 * x summed with zeros).
    precision = jax.lax.Precision.HIGHEST if x.dtype == jnp.float32 else None
    patches = jax.lax.conv_general_dilated_patches(
        x,
        filter_shape=(kh, kw),
        window_strides=(stride, stride),
        padding=((pad, pad), (pad, pad)),
        dimension_numbers=("NCHW", "OIHW", "NCHW"),
        precision=precision,
    )
    B = x.shape[0]
    _, K, Hout, Wout = patches.shape
    patches = patches.transpose(0, 2, 3, 1).reshape(B * Hout * Wout, K)
    return patches, Hout, Wout


def _choose_tile_m(M, tile_m):
    """Row-tile size: <= tile_m, multiple of 8 (sublane), and — when M is large
    enough — giving an even grid >= 2 so the single 'parallel' axis load-balances
    across both TensorCores on v7x megacore.  tile_m=2048 keeps total VMEM ~4 MiB
    (double-buffered), well inside v5e's 16 MiB scoped default."""
    tile_m = max(8, _round_up(tile_m, 8))
    if M <= 8:
        return 8
    g = max(2, pl.cdiv(M, tile_m))
    if g % 2:
        g += 1
    tm = _round_up(pl.cdiv(M, g), 8)
    return max(8, min(tm, tile_m))


def overlap_patch_embed(x, conv_w, conv_b, ln_gamma, ln_beta,
                        patch_size=7, stride=4, eps=1e-5,
                        compute_dtype=jnp.bfloat16, out_dtype=jnp.float32,
                        tile_m=2048):
    """x: (B, C, H, W). Returns (out, Hout, Wout), out: (B, Hout*Wout, E) of out_dtype."""
    B, C, H, W = x.shape
    E = conv_w.shape[0]
    kh = kw = patch_size
    pad = patch_size // 2

    # Cast BEFORE im2col so the (M, K) intermediate materializes directly in the
    # compute dtype (no separate astype pass over the inflated patches).
    x = x.astype(compute_dtype)
    patches, Hout, Wout = _im2col(x, kh, kw, stride, pad)                 # (M, K)
    M, K = patches.shape

    tm = _choose_tile_m(M, tile_m)
    grid_m = pl.cdiv(M, tm)           # ragged last block handled by Pallas masking

    w_mat = conv_w.reshape(E, C * kh * kw).T.astype(compute_dtype)        # (K, E)
    params = jnp.stack([conv_b, ln_gamma, ln_beta]).astype(jnp.float32)   # (3, E)

    in_bytes = jnp.dtype(compute_dtype).itemsize
    out_bytes = jnp.dtype(out_dtype).itemsize
    cost = pl.CostEstimate(
        flops=2 * grid_m * tm * K * E,
        transcendentals=grid_m * tm,   # one rsqrt per row
        bytes_accessed=(grid_m * tm * K * in_bytes + K * E * in_bytes
                        + 3 * E * 4 + grid_m * tm * E * out_bytes),
    )

    kernel = functools.partial(_patch_embed_kernel, eps=eps)
    out = pl.pallas_call(
        kernel,
        out_shape=jax.ShapeDtypeStruct((M, E), out_dtype),
        grid_spec=pltpu.PrefetchScalarGridSpec(
            num_scalar_prefetch=0,
            grid=(grid_m,),
            in_specs=[
                pl.BlockSpec((tm, K), lambda i: (i, 0)),   # streamed, double-buffered
                pl.BlockSpec((K, E), lambda i: (0, 0)),    # resident weight
                pl.BlockSpec((3, E), lambda i: (0, 0)),    # resident bias/gamma/beta
            ],
            out_specs=pl.BlockSpec((tm, E), lambda i: (i, 0)),
        ),
        compiler_params=pltpu.CompilerParams(
            dimension_semantics=("parallel",)),            # megacore sharding on v7x
        cost_estimate=cost,
    )(patches, w_mat, params)

    out = out.reshape(B, Hout * Wout, E)
    return out, Hout, Wout


def _reference(x, conv_w, conv_b, ln_gamma, ln_beta, patch_size=7, stride=4, eps=1e-5):
    pad = patch_size // 2
    y = jax.lax.conv_general_dilated(
        x, conv_w, window_strides=(stride, stride),
        padding=((pad, pad), (pad, pad)),
        dimension_numbers=("NCHW", "OIHW", "NCHW"),
        precision=jax.lax.Precision.HIGHEST)
    y = y + conv_b.reshape(1, -1, 1, 1)
    B, E, H, W = y.shape
    y = y.reshape(B, E, H * W).transpose(0, 2, 1)
    mean = jnp.mean(y, axis=-1, keepdims=True)
    var = jnp.mean(jnp.square(y - mean), axis=-1, keepdims=True)
    y = (y - mean) / jnp.sqrt(var + eps)
    return y * ln_gamma + ln_beta, H, W


if __name__ == "__main__":
    # Small shapes consistent with the module's forward:
    # batch=2, in_chans=4, img_size=16, patch_size=7, stride=4, embed_dim=32
    B, C, HW, E = 2, 4, 16, 32
    patch_size, stride = 7, 4

    key = jax.random.PRNGKey(0)
    kx, kw_, kb, kg, kbe = jax.random.split(key, 5)

    x = jax.random.normal(kx, (B, C, HW, HW), dtype=jnp.float32)
    conv_w = jax.random.normal(kw_, (E, C, patch_size, patch_size), jnp.float32) * 0.05
    conv_b = jax.random.normal(kb, (E,), jnp.float32) * 0.05
    ln_gamma = jnp.ones((E,), jnp.float32) + 0.1 * jax.random.normal(kg, (E,), jnp.float32)
    ln_beta = 0.1 * jax.random.normal(kbe, (E,), jnp.float32)

    ref, Hr, Wr = _reference(x, conv_w, conv_b, ln_gamma, ln_beta,
                             patch_size=patch_size, stride=stride)

    # f32 verification path (module semantics; HIGHEST-precision patch extraction).
    out32, Hout, Wout = overlap_patch_embed(
        x, conv_w, conv_b, ln_gamma, ln_beta,
        patch_size=patch_size, stride=stride,
        compute_dtype=jnp.float32, out_dtype=jnp.float32)
    out32 = jax.block_until_ready(out32)
    assert (Hout, Wout) == (Hr, Wr)
    assert out32.shape == (B, Hout * Wout, E)
    err32 = float(jnp.max(jnp.abs(out32 - ref)))
    # Default MXU precision may round f32 operands to bf16 inside the kernel; 2e-2
    # covers that while still catching any layout / ordering / LayerNorm mistake.
    assert err32 < 2e-2, f"f32 path mismatch: {err32}"

    # bf16 fast path: bf16 patches (half the dominant HBM stream), bf16 output
    # (half the writeback); f32 accumulation + f32 LN statistics in-kernel.
    out16, Hout16, Wout16 = overlap_patch_embed(
        x, conv_w, conv_b, ln_gamma, ln_beta,
        patch_size=patch_size, stride=stride,
        compute_dtype=jnp.bfloat16, out_dtype=jnp.bfloat16)
    out16 = jax.block_until_ready(out16)
    assert (Hout16, Wout16) == (Hr, Wr)
    assert out16.shape == (B, Hout16 * Wout16, E)
    err16 = float(jnp.max(jnp.abs(out16.astype(jnp.float32) - ref)))
    assert err16 < 7.5e-2, f"bf16 path mismatch: {err16}"

    print("KERNEL_OK")
</pallas_src>

<mosaic_0001>
module attributes {stable_mosaic.version = 11 : i64} {
  func.func @_patch_embed_kernel(%arg0: i32, %arg1: memref<16x196xf32, #tpu.memory_space<vmem>>, %arg2: memref<196x32xf32, #tpu.memory_space<vmem>>, %arg3: memref<3x32xf32, #tpu.memory_space<vmem>>, %arg4: memref<16x32xf32, #tpu.memory_space<vmem>>) attributes {dimension_semantics = [#tpu.dimension_semantics<parallel>], iteration_bounds = array<i64: 2>, scalar_prefetch = 0 : i64, scratch_operands = 0 : i64, tpu.core_type = #tpu.core_type<tc>, window_params = [{transform_indices = @transform_0, window_bounds = array<i64: 16, 196>}, {pipeline_mode = #tpu.pipeline_mode<synchronous>, transform_indices = @transform_1, window_bounds = array<i64: 196, 32>}, {pipeline_mode = #tpu.pipeline_mode<synchronous>, transform_indices = @transform_2, window_bounds = array<i64: 3, 32>}, {transform_indices = @transform_3, window_bounds = array<i64: 16, 32>}]} {
    %c0 = arith.constant 0 : index
    %c0_0 = arith.constant 0 : index
    %0 = vector.load %arg1[%c0, %c0_0] : memref<16x196xf32, #tpu.memory_space<vmem>>, vector<16x196xf32>
    %c0_1 = arith.constant 0 : index
    %c0_2 = arith.constant 0 : index
    %1 = vector.load %arg2[%c0_1, %c0_2] : memref<196x32xf32, #tpu.memory_space<vmem>>, vector<196x32xf32>
    %cst = arith.constant dense<0.000000e+00> : vector<16x32xf32>
    %2 = tpu.matmul %0, %1, %cst {dimension_numbers = #tpu.dot_dimension_numbers<[1], [0], [0], [1], [0, 0, 1, 1], [], []>} : vector<16x196xf32>, vector<196x32xf32>, vector<16x32xf32> -> vector<16x32xf32>
    %c0_3 = arith.constant 0 : index
    %c0_4 = arith.constant 0 : index
    %3 = vector.load %arg3[%c0_3, %c0_4] : memref<3x32xf32, #tpu.memory_space<vmem>>, vector<3x32xf32>
    %4 = vector.extract_strided_slice %3 {offsets = [0, 0], sizes = [1, 32], strides = [1, 1]} : vector<3x32xf32> to vector<1x32xf32>
    %5 = vector.broadcast %4 : vector<1x32xf32> to vector<16x32xf32>
    %6 = arith.addf %2, %5 : vector<16x32xf32>
    %cst_5 = arith.constant dense<0.000000e+00> : vector<16xf32>
    %7 = vector.multi_reduction <add>, %6, %cst_5 [1] : vector<16x32xf32> to vector<16xf32>
    %8 = vector.shape_cast %7 : vector<16xf32> to vector<16x1xf32>
    %cst_6 = arith.constant 3.200000e+01 : f32
    %9 = vector.broadcast %cst_6 : f32 to vector<16x1xf32>
    %10 = arith.divf %8, %9 : vector<16x1xf32>
    %11 = arith.mulf %6, %6 : vector<16x32xf32>
    %cst_7 = arith.constant dense<0.000000e+00> : vector<16xf32>
    %12 = vector.multi_reduction <add>, %11, %cst_7 [1] : vector<16x32xf32> to vector<16xf32>
    %13 = vector.shape_cast %12 : vector<16xf32> to vector<16x1xf32>
    %cst_8 = arith.constant 3.200000e+01 : f32
    %14 = vector.broadcast %cst_8 : f32 to vector<16x1xf32>
    %15 = arith.divf %13, %14 : vector<16x1xf32>
    %16 = arith.mulf %10, %10 : vector<16x1xf32>
    %17 = arith.subf %15, %16 : vector<16x1xf32>
    %cst_9 = arith.constant 0.000000e+00 : f32
    %18 = vector.broadcast %cst_9 : f32 to vector<16x1xf32>
    %19 = arith.maximumf %17, %18 : vector<16x1xf32>
    %20 = vector.broadcast %10 : vector<16x1xf32> to vector<16x32xf32>
    %21 = arith.subf %6, %20 : vector<16x32xf32>
    %cst_10 = arith.constant 9.99999974E-6 : f32
    %22 = vector.broadcast %cst_10 : f32 to vector<16x1xf32>
    %23 = arith.addf %19, %22 : vector<16x1xf32>
    %24 = math.rsqrt %23 : vector<16x1xf32>
    %25 = vector.broadcast %24 : vector<16x1xf32> to vector<16x32xf32>
    %26 = arith.mulf %21, %25 : vector<16x32xf32>
    %27 = vector.extract_strided_slice %3 {offsets = [1, 0], sizes = [1, 32], strides = [1, 1]} : vector<3x32xf32> to vector<1x32xf32>
    %28 = vector.broadcast %27 : vector<1x32xf32> to vector<16x32xf32>
    %29 = arith.mulf %26, %28 : vector<16x32xf32>
    %30 = vector.extract_strided_slice %3 {offsets = [2, 0], sizes = [1, 32], strides = [1, 1]} : vector<3x32xf32> to vector<1x32xf32>
    %31 = vector.broadcast %30 : vector<1x32xf32> to vector<16x32xf32>
    %32 = arith.addf %29, %31 : vector<16x32xf32>
    %c0_11 = arith.constant 0 : index
    %c0_12 = arith.constant 0 : index
    %33 = vector.load %arg4[%c0_11, %c0_12] : memref<16x32xf32, #tpu.memory_space<vmem>>, vector<16x32xf32>
    tpu.vector_store %arg4[%c0_11, %c0_12], %32 {strides = array<i32>} : memref<16x32xf32, #tpu.memory_space<vmem>>, vector<16x32xf32>,
    return
  }
  func.func @transform_0(%arg0: i32) -> (i32, i32) {
    %c0_i32 = arith.constant 0 : i32
    %c0_i32_0 = arith.constant 0 : i32
    return %arg0, %c0_i32 : i32, i32
  }
  func.func @transform_1(%arg0: i32) -> (i32, i32) {
    %c0_i32 = arith.constant 0 : i32
    %c0_i32_0 = arith.constant 0 : i32
    %c0_i32_1 = arith.constant 0 : i32
    return %c0_i32, %c0_i32_0 : i32, i32
  }
  func.func @transform_2(%arg0: i32) -> (i32, i32) {
    %c0_i32 = arith.constant 0 : i32
    %c0_i32_0 = arith.constant 0 : i32
    %c0_i32_1 = arith.constant 0 : i32
    return %c0_i32, %c0_i32_0 : i32, i32
  }
  func.func @transform_3(%arg0: i32) -> (i32, i32) {
    %c0_i32 = arith.constant 0 : i32
    %c0_i32_0 = arith.constant 0 : i32
    return %arg0, %c0_i32 : i32, i32
  }
}

</mosaic_0001>

<bundles_post_ra>
// kernel: tpu_custom_call.1
= control target key start
LH: loop header
LB: loop body
LE: loop exit
PB: predicated region body
PF: predicated region fallthrough
CT: control target
= control target key end

     0   :  { %8 = vsyncpa [#allocation3], 0  ;;  %s851_s0 = inlined_call_operand.vmem [shape: f32[32,196], index: 0, kind: input, shape index: {}]   ;;  %s852_s1 = inlined_call_operand.vmem [shape: f32[196,32], index: 1, kind: input, shape index: {}]   ;;  %s853_s2 = inlined_call_operand.vmem [shape: f32[3,32], index: 2, kind: input, shape index: {}]   ;;  %s854_s3 = inlined_call_operand.hbm [shape: f32[32,32], index: 3, kind: output, shape index: {}]  }
   0x1   :  { %10 = vsyncpa [#allocation3 + $0x1], 0  ;;  %s635_s12 = smov 0   ;;  %s637_s13 = smov 0  }
   0x2   :  { %s639_s14 = smov 0   ;;  %s641_s15 = smov 0  }
   0x3 LB: > { %s656_s16 = sadd.s32 4294967295, %s608_s15   ;;  %s419_s17 = sadd.s32 4294967294, %s608_s15   ;;  %s608_s15 = sphi %s641_s15, %s860_s15   ;;  %s604_s14 = sphi %s639_s14, %s859_s14   ;;  %s600_s13 = sphi %s637_s13, %s858_s13   ;;  %s596_s12 = sphi %s635_s12, %s857_s12  }
   0x4   : > { %s660_s18 = sadd.s32 1, %s608_s15   ;;  %s91_s19 = sadd.s32 1, %s604_s14 }
   0x5   : > { %s88_s20 = ssub.s32 %s608_s15, %s660_s18  ;;  %p101_p0 = scmp.ne.s32.totalorder %s604_s14, %s600_s13 }
   0x6   : > { %p89_p1 = scmp.eq.s32.totalorder %s88_s20, 0  ;;  %p102_p2 = scmp.eq.s32.totalorder %s656_s16, 1 }
   0x7   : > { %p107_p3 = scmp.ne.s32.totalorder %s600_s13, %s596_s12  ;;  %p108_p4 = scmp.eq.s32.totalorder %s419_s17, 1 }
   0x8   : > { %s671_s21 = scalar_select %p89_p1, %s604_s14, %s91_s19  }
   0x9   : > { %p673_p5 = por %p102_p2, %p101_p0  ;;  %p677_p6 = por %p108_p4, %p107_p3 }
   0xa   : > { %p422_p7 = scmp.ge.s32.totalorder %s608_s15, 1  ;;  %p142_p8 = scmp.lt.s32.totalorder %s608_s15, 3 }
   0xc   : > { %p143_p9 = pnand %p422_p7, %p142_p8 }
   0xd   : > { %v179_v0 = vld [vmem:[%s852_s1] sm:$0xff] (!%p143_p9)  ;;  %v180_v1 = vld [vmem:[%s852_s1 + $0x8] sm:$0xff] (!%p143_p9)  ;;  %v181_v2 = vld [vmem:[%s852_s1 + $0x10] sm:$0xff] (!%p143_p9)  ;;  %v610_v3 = vmov (!%p143_p9), 0.0|0.0   ;;  %s424_s5 = sshll.u32 (!%p143_p9), %s656_s16, 1  ;;  %vm209_vm0 = vcmask (!%p143_p9), 556032   ;;  %v205_v43 = vlaneseq (!%p143_p9) }
   0xe   : > { %146 = sbr.rel (%p143_p9) target bundleno = 468 (0x1d4), region = 32  ;;  %437 = vmatprep.subr.bf16.mxu0 (!%p143_p9), %v610_v3  ;;  %v438_v4 = vpack.c.bf16 (!%p143_p9), %v180_v1, %v179_v0  ;;  %473 = vmatprep.subr.bf16.mxu1 (!%p143_p9), %v610_v3  ;;  %v182_v5 = vld [vmem:[%s852_s1 + $0x18] sm:$0xff] (!%p143_p9)  ;;  %p168_p10 = scmp.lt.s32.totalorder (!%p143_p9), %s424_s5, 3  ;;  %v183_v7 = vld [vmem:[%s852_s1 + $0x20] sm:$0xff] (!%p143_p9)  ;;  %v184_v8 = vld [vmem:[%s852_s1 + $0x28] sm:$0xff] (!%p143_p9)  ;;  %v611_v39 = vmov (!%p143_p9), 0.0  }
   0xf   : > { %v441_v6 = vpack.c.bf16 (!%p143_p9), %v182_v5, %v181_v2  ;;  %v444_v9 = vpack.c.bf16 (!%p143_p9), %v184_v8, %v183_v7  ;;  %v185_v10 = vld [vmem:[%s852_s1 + $0x30] sm:$0xff] (!%p143_p9)  ;;  %v186_v11 = vld [vmem:[%s852_s1 + $0x38] sm:$0xff] (!%p143_p9)  ;;  %v187_v15 = vld [vmem:[%s852_s1 + $0x40] sm:$0xff] (!%p143_p9)  ;;  %vm216_vm1 = vcmask (!%p143_p9), 1043456   ;;  %v206_v44 = vshrl.u32 (!%p143_p9), %v205_v43, 7  ;;  %s436_s30 = sshll.u32 (!%p143_p9), %s656_s16, 8 }
  0x10   : > { %439 = vmatpush1.bf16.msra.mxu0 (!%p143_p9), %v438_v4  ;;  %486 = vmatpush1.bf16.msra.mxu1 (!%p143_p9), %v438_v4  ;;  %v447_v14 = vpack.c.bf16 (!%p143_p9), %v186_v11, %v185_v10  ;;  %v188_v16 = vld [vmem:[%s852_s1 + $0x48] sm:$0xff] (!%p143_p9)  ;;  %v189_v18 = vld [vmem:[%s852_s1 + $0x50] sm:$0xff] (!%p143_p9)  ;;  %v190_v19 = vld [vmem:[%s852_s1 + $0x58] sm:$0xff] (!%p143_p9)  ;;  %vm295_vm2 = vcmask (!%p143_p9), 261120   ;;  %s805_s8 = scalar_lea.hbm (!%p143_p9), %s854_s3, %s436_s30 }
  0x11   : > { %440 = vmatprep.subr.bf16.mxu0 (!%p143_p9), %v610_v3  ;;  %474 = vmatprep.subr.bf16.mxu1 (!%p143_p9), %v610_v3  ;;  %v450_v17 = vpack.c.bf16 (!%p143_p9), %v188_v16, %v187_v15  ;;  %v453_v20 = vpack.c.bf16 (!%p143_p9), %v190_v19, %v189_v18  ;;  %v191_v21 = vld [vmem:[%s852_s1 + $0x60] sm:$0xff] (!%p143_p9)  ;;  %v192_v22 = vld [vmem:[%s852_s1 + $0x68] sm:$0xff] (!%p143_p9)  ;;  %v193_v24 = vld [vmem:[%s852_s1 + $0x70] sm:$0xff] (!%p143_p9)  ;;  %v207_v45 = vsub.s32 (!%p143_p9), 0, %v206_v44 }
  0x12   : > { %v456_v23 = vpack.c.bf16 (!%p143_p9), %v192_v22, %v191_v21  ;;  %v194_v25 = vld [vmem:[%s852_s1 + $0x78] sm:$0xff] (!%p143_p9)  ;;  %v195_v27 = vld [vmem:[%s852_s1 + $0x80] sm:$0xff] (!%p143_p9)  ;;  %v196_v28 = vld [vmem:[%s852_s1 + $0x88] sm:$0xff] (!%p143_p9) }
  0x13   : > { %v459_v26 = vpack.c.bf16 (!%p143_p9), %v194_v25, %v193_v24  ;;  %v462_v29 = vpack.c.bf16 (!%p143_p9), %v196_v28, %v195_v27  ;;  %v197_v30 = vld [vmem:[%s852_s1 + $0x90] sm:$0xff] (!%p143_p9)  ;;  %v198_v31 = vld [vmem:[%s852_s1 + $0x98] sm:$0xff] (!%p143_p9)  ;;  %v199_v33 = vld [vmem:[%s852_s1 + $0xa0] sm:$0xff] (!%p143_p9) }
  0x14   : > { %442 = vmatpush1.bf16.msra.mxu0 (!%p143_p9), %v441_v6  ;;  %487 = vmatpush1.bf16.msra.mxu1 (!%p143_p9), %v441_v6  ;;  %v465_v32 = vpack.c.bf16 (!%p143_p9), %v198_v31, %v197_v30  ;;  %v200_v34 = vld [vmem:[%s852_s1 + $0xa8] sm:$0xff] (!%p143_p9)  ;;  %v201_v36 = vld [vmem:[%s852_s1 + $0xb0] sm:$0xff] (!%p143_p9)  ;;  %v202_v37 = vld [vmem:[%s852_s1 + $0xb8] sm:$0xff] (!%p143_p9) }
  0x15   : > { %s862_s5 = smov (!%p168_p10, %s424_s5), 3  ;;  %443 = vmatprep.subr.bf16.mxu0 %v610_v3  ;;  %475 = vmatprep.subr.bf16.mxu1 %v610_v3  ;;  %v468_v35 = vpack.c.bf16 %v200_v34, %v199_v33  ;;  %v471_v38 = vpack.c.bf16 %v202_v37, %v201_v36  ;;  %v203_v40 = vld [vmem:[%s852_s1 + $0xc0] sm:$0xf] }
  0x16   : > { %s435_s10 = sshll.u32 %s862_s5, 4  ;;  %v204_v46 = vld [vmem:[%s853_s2] sm:$0x7] }
  0x17   : > { %s709_s19 = scalar_lea.vmem %s851_s0, %s435_s10  ;;  %v208_v47 = vrot.slane %v204_v46, %v207_v45  ;;  %s612_s10 = smov [#allocation2]  }
  0x18   : > { %v176_v12 = vld [vmem:[%s709_s19 + $0x8] sm:$0xff]  ;;  %v178_v13 = vld [vmem:[%s709_s19 + $0x18] sm:$0xff]  ;;  %445 = vmatpush1.bf16.msra.mxu0 %v444_v9  ;;  %488 = vmatpush1.bf16.msra.mxu1 %v444_v9  ;;  %v175_v41 = vld [vmem:[%s709_s19] sm:$0xff]  ;;  %s550_s11 = sshll.u32 %s612_s10, 4  ;;  %s551_s11 = int_to_ptr.vmem [resolvable:$false] %s550_s11 }
  0x19   : > { %428 = vmatprep.mubr.msk.f32.mxu0 %vm209_vm0, %v176_v12  ;;  %429 = vmatprep.mubr.msk.f32.mxu1 %vm209_vm0, %v178_v13  ;;  %v177_v42 = vld [vmem:[%s709_s19 + $0x10] sm:$0xff]  ;;  %v331_v12 = vsub.s32 1, %v206_v44  ;;  %v337_v13 = vsub.s32 2, %v206_v44  ;;  %s164_s19 = sand.u32 1, %s600_s13   ;;  %s552_s17 = scalar_lea.vmem %s551_s11, 512 }
  0x1a   : > { %446 = vmatprep.subr.bf16.mxu0 %v610_v3  ;;  %476 = vmatprep.subr.bf16.mxu1 %v610_v3  ;;  %s423_s29 = sshll.u32 %s164_s19, 4  ;;  %s810_s9 = scalar_lea.sflag [#allocation3], %s164_s19 }
  0x1b   : > { %s166_s4 = scalar_lea.vmem [#allocation2], %s423_s29 }
  0x1c   : > { %448 = vmatpush1.bf16.msra.mxu0 %v447_v14  ;;  %489 = vmatpush1.bf16.msra.mxu1 %v447_v14  ;;  %v332_v14 = vrot.slane %v204_v46, %v331_v12  ;;  %s357_s5 = sshll.u32 %s166_s4, 4  ;;  %s807_s5 = int_to_ptr.vmem [resolvable:$true] %s357_s5 }
  0x1d   : > { %449 = vmatprep.subr.bf16.mxu0 %v610_v3  ;;  %477 = vmatprep.subr.bf16.mxu1 %v610_v3  ;;  %s546_s16 = scalar_lea.vmem %s807_s5, 256  ;;  %p553_p0 = scmp.lt.s32.totalorder %s807_s5, %s551_s11 }
  0x1e   : > { %p547_p11 = scmp.ne.s32.totalorder %s807_s5, %s546_s16  ;;  %p554_p1 = scmp.lt.s32.totalorder %s552_s17, %s546_s16 }
  0x20   : > { %451 = vmatpush1.bf16.msra.mxu0 %v450_v17  ;;  %490 = vmatpush1.bf16.msra.mxu1 %v450_v17  ;;  %v338_v17 = vrot.slane %v204_v46, %v337_v13  ;;  %p548_p12 = pnand %p547_p11, %p673_p5  ;;  %p555_p2 = por %p554_p1, %p553_p0 }
  0x21   : > { %452 = vmatprep.subr.bf16.mxu0 %v610_v3  ;;  %478 = vmatprep.subr.bf16.mxu1 %v610_v3 }
  0x22   : > { %p549_p13 = pneg %p548_p12 }
  0x24   : > { %454 = vmatpush1.bf16.msra.mxu0 %v453_v20  ;;  %491 = vmatpush1.bf16.msra.mxu1 %v453_v20  ;;  %p556_p3 = pnand %p555_p2, %p549_p13 }
  0x25   : > { %455 = vmatprep.subr.bf16.mxu0 %v610_v3  ;;  %479 = vmatprep.subr.bf16.mxu1 %v610_v3 }
  0x28   : > { %457 = vmatpush1.bf16.msra.mxu0 %v456_v23  ;;  %492 = vmatpush1.bf16.msra.mxu1 %v456_v23 }
  0x29   : > { %458 = vmatprep.subr.bf16.mxu0 %v610_v3  ;;  %480 = vmatprep.subr.bf16.mxu1 %v610_v3 }
  0x2c   : > { %460 = vmatpush1.bf16.msra.mxu0 %v459_v26  ;;  %493 = vmatpush1.bf16.msra.mxu1 %v459_v26 }
  0x2d   : > { %461 = vmatprep.subr.bf16.mxu0 %v610_v3  ;;  %481 = vmatprep.subr.bf16.mxu1 %v610_v3 }
  0x30   : > { %463 = vmatpush1.bf16.msra.mxu0 %v462_v29  ;;  %494 = vmatpush1.bf16.msra.mxu1 %v462_v29 }
  0x31   : > { %464 = vmatprep.subr.bf16.mxu0 %v610_v3  ;;  %482 = vmatprep.subr.bf16.mxu1 %v610_v3 }
  0x34   : > { %466 = vmatpush1.bf16.msra.mxu0 %v465_v32  ;;  %495 = vmatpush1.bf16.msra.mxu1 %v465_v32 }
  0x35   : > { %467 = vmatprep.subr.bf16.mxu0 %v610_v3  ;;  %483 = vmatprep.subr.bf16.mxu1 %v610_v3 }
  0x38   : > { %469 = vmatpush1.bf16.msra.mxu0 %v468_v35  ;;  %496 = vmatpush1.bf16.msra.mxu1 %v468_v35 }
  0x39   : > { %470 = vmatprep.subr.bf16.mxu0 %v610_v3  ;;  %484 = vmatprep.subr.bf16.mxu1 %v610_v3 }
  0x3c   : > { %472 = vmatpush1.bf16.msra.mxu0 %v471_v38  ;;  %497 = vmatpush1.bf16.msra.mxu1 %v471_v38 }
  0x3d   : > { %268 = vmatprep.subr.mxu0 %v611_v39  ;;  %485 = vmatprep.subr.mxu1 %v611_v39 }
  0x40   : > { %427 = vmatpush1.msk.msra.mxu0 %vm216_vm1, %v203_v40  ;;  %498 = vmatpush1.msk.msra.mxu1 %vm216_vm1, %v203_v40 }
  0x41   : > { %285 = vmatmul.mubr.f32.vlgmr.msra.gmra.mrb[0].mxu0 %v175_v41  ;;  %290 = vmatmul.mubr.f32.vlgmr.msra.gmra.mrb[0].mxu1 %v177_v42 }
 0x114   : > { %v286_v48 = vpop.f32.mrb[0].mxu0  ;;  %v291_v49 = vpop.f32.mrb[0].mxu1 }
 0x115   : > { %v287_v50 = vadd.f32 %v286_v48, %v208_v47  ;;  %v288_v51 = vpop.f32.mrb[1].mxu0  ;;  %v292_v52 = vadd.f32 %v291_v49, %v208_v47  ;;  %v293_v53 = vpop.f32.mrb[1].mxu1 }
 0x117   : > { %v296_v54 = vsel %vm295_vm2, %v287_v50, 0.0  ;;  %v305_v55 = vmul.f32 %v287_v50, %v287_v50  ;;  %v306_v56 = vmul.f32 %v292_v52, %v292_v52  ;;  %v299_v58 = vsel %vm295_vm2, %v292_v52, 0.0 }
 0x118   : > { %297 = vadd.xlane.f32.xlu0 %v296_v54 }
 0x119   : > { %v307_v57 = vsel %vm295_vm2, %v305_v55, 0.0  ;;  %v310_v59 = vsel %vm295_vm2, %v306_v56, 0.0 }
 0x11a   : > { %308 = vadd.xlane.f32.xlu1 %v307_v57 }
 0x11c   : > { %300 = vadd.xlane.f32.xlu0 %v299_v58 }
 0x11e   : > { %311 = vadd.xlane.f32.xlu1 %v310_v59 }
 0x1a5   : > { %v298_v60 = vpop.xlane.xlu0 %297 }
 0x1a6   : > { %v303_v61 = vmul.f32 0.03125, %v298_v60 }
 0x1a7   : > { %v309_v62 = vpop.xlane.xlu1 %308 }
 0x1a8   : > { %v315_v63 = vmul.f32 %v303_v61, %v303_v61  ;;  %v313_v0 = vmul.f32 0.03125, %v309_v62  ;;  %v321_v15 = vsub.f32 %v287_v50, %v303_v61 }
 0x1a9   : > { %v301_v1 = vpop.xlane.xlu0 %300 }
 0x1aa   : > { %v317_v2 = vsub.f32 %v313_v0, %v315_v63  ;;  %v304_v3 = vmul.f32 0.03125, %v301_v1 }
 0x1ab   : > { %v312_v4 = vpop.xlane.xlu1 %311 }
 0x1ac   : > { %v319_v5 = vmax.f32 %v317_v2, 0.0  ;;  %v316_v6 = vmul.f32 %v304_v3, %v304_v3  ;;  %v314_v7 = vmul.f32 0.03125, %v312_v4  ;;  %v322_v20 = vsub.f32 %v292_v52, %v304_v3 }
 0x1ae   : > { %v323_v8 = vadd.f32 1e-05, %v319_v5  ;;  %v318_v9 = vsub.f32 %v314_v7, %v316_v6 }
 0x1b0   : > { %542 = vrsqrt.f32 %v323_v8  ;;  %v320_v10 = vmax.f32 %v318_v9, 0.0 }
 0x1b2   : > { %v324_v11 = vadd.f32 1e-05, %v320_v10 }
 0x1b4   : > { %544 = vrsqrt.f32 %v324_v11 }
 0x1ba   : > { %v543_v16 = vpop.eup %542 }
 0x1bb   : > { %v327_v18 = vmul.f32 %v543_v16, %v321_v15 }
 0x1bd   : > { %v333_v19 = vmul.f32 %v332_v14, %v327_v18 }
 0x1be   : > { %v545_v21 = vpop.eup %544 }
 0x1bf   : > { %v328_v22 = vmul.f32 %v545_v21, %v322_v20  ;;  %v339_v23 = vadd.f32 %v338_v17, %v333_v19 }
 0x1c1   : > { %v334_v24 = vmul.f32 %v332_v14, %v328_v22  ;;  %341 = vst.msk [vmem:[%s166_s4] sm:$0xff] %vm295_vm2, %v339_v23 }
 0x1c3   : > { %v340_v25 = vadd.f32 %v338_v17, %v334_v24 }
 0x1c5   : > { %342 = vst.msk [vmem:[%s166_s4 + $0x8] sm:$0xff] %vm295_vm2, %v340_v25 }
 0x1c6   : > { %559 = shalt.err (!%p556_p3)
}
 0x1c7   : > { %s560_s20 = scalar_lea.hbm %s805_s8, 256  ;;  %s564_s26 = scalar_lea.hbm %s854_s3, 512 }
 0x1c8   : > { %p561_p4 = scmp.ne.s32.totalorder %s805_s8, %s560_s20  ;;  %p565_p9 = scmp.lt.u32.totalorder %s805_s8, %s854_s3 }
 0x1c9   : > { %p566_p10 = scmp.lt.u32.totalorder %s564_s26, %s560_s20  ;;  %p568_p12 = scmp.lt.u32.totalorder %s560_s20, %s805_s8 }
 0x1ca   : > { %p562_p7 = pnand %p561_p4, %p673_p5 }
 0x1cb   : > { %p567_p11 = por %p566_p10, %p565_p9 }
 0x1cc   : > { %p563_p8 = pneg %p562_p7 }
 0x1cd   : > { %p569_p13 = por %p568_p12, %p567_p11 }
 0x1cf   : > { %p570_p0 = pnand %p569_p13, %p563_p8 }
 0x1d1   : > { %573 = shalt.err (!%p570_p0)
}
 0x1d2   : > { %s613_s19 = smov 128   ;;  %s614_s29 = smov 8  }
 0x1d3   : > { %499 = dma.vmem_to_hbm [thread:$0]  (%p673_p5), %s807_s5, 256, %s805_s8, %s810_s9, %s613_s19, %s613_s19, %s614_s29  }
 0x1d4 PF: > { %p505_p1 = scmp.ge.s32.totalorder %s608_s15, 2  ;;  %s372_s30 = sand.u32 1, %s596_s12  }
 0x1d5   : > { %s373_s4 = scalar_lea.sflag [#allocation3], %s372_s30 }
 0x1d6   : > { %p502_p2 = pnand %p505_p1, %p677_p6 }
 0x1d8   : > { %591 = dma.done.wait (!%p502_p2), %s373_s4, 256  }
 0x1d9   : > { %593 = vsyncadd (!%p502_p2), %s373_s4, 4294967040  ;;  %p13_p3 = scmp.ge.s32.totalorder %s660_s18, 4   ;;  %s857_s12 = smov %s600_s13 }
 0x1da   : > { %s858_s13 = smov %s604_s14  ;;  %s859_s14 = smov %s671_s21 }
 0x1db   : > { %s860_s15 = smov %s660_s18  ;;  %15 = sbr.rel (!%p13_p3) target bundleno = 3 (0x3), region = 67 }
 0x1e2   :  { %378 = vsyncpa [#allocation3], 1 }
 0x1e3   :  { %380 = vsyncpa [#allocation3 + $0x1], 1 }

</bundles_post_ra>
